<compile_context>
chip_gen: v7x
topology: tpu7x:2x2x1
jax: 0.10.0
libtpu: 0.0.40
codegen_flags: <defaults>
</compile_context>

<pallas_src>
import jax
import jax.numpy as jnp
from jax.experimental import pallas as pl
from jax.experimental.pallas import tpu as pltpu


def _vmem():
    return pl.BlockSpec(memory_space=pltpu.MemorySpace.VMEM)


# ----------------------------------------------------------------------------
# Kernel 1: fused GRU cell + q_z_net + gaussian sample + KL + z-conditioning
# ----------------------------------------------------------------------------
def gru_head_kernel(x_ref, h_ref, eps_ref, mats_ref, vecs_ref, out_ref):
    f32 = jnp.float32
    x = x_ref[...]                         # (B, 64)
    h = h_ref[...]                         # (B, 32)
    M = mats_ref[...]                      # (160, 192) packed matrices
    V = vecs_ref[...]                      # (8, 192)   packed bias rows

    # fused GRU matmul: [x|h] @ [[Wi, 0], [0, Wh]] -> [gi(96) | gh(96)]
    # (gate layout: column-stacked [r|u|n], weights pre-transposed to (in, 3H))
    xh = jnp.concatenate([x, h], axis=1)                                   # (B, 96)
    g = jnp.dot(xh, M[0:96, :], preferred_element_type=f32) + V[0:1, :]    # (B, 192)
    gi = g[:, 0:96]
    gh = g[:, 96:192]
    r = jax.nn.sigmoid(gi[:, 0:32] + gh[:, 0:32])
    u = jax.nn.sigmoid(gi[:, 32:64] + gh[:, 32:64])
    n = jnp.tanh(gi[:, 64:96] + r * gh[:, 64:96])
    h_n = (1.0 - u) * n + u * h                                            # (B, 32)

    # q_z_net: MLP(32, 32, 64), output = [mu | sigma_pre]
    t = jax.nn.relu(jnp.dot(h_n, M[96:128, 0:32],
                            preferred_element_type=f32) + V[1:2, 0:32])
    g2 = jnp.dot(t, M[96:128, 32:96],
                 preferred_element_type=f32) + V[2:3, 0:64]                # (B, 64)
    mu = g2[:, 0:32]
    sigma = jax.nn.softplus(g2[:, 32:64]) + 1e-4

    # reparameterized sample (eps drawn outside with PRNGKey)
    z = mu + sigma * eps_ref[...]                                          # (B, 32)

    # KL( N(mu, sigma) || N(0, 1) ), summed over latent dim (first-timestep prior)
    kl = jnp.sum(-jnp.log(sigma) + 0.5 * (sigma * sigma + mu * mu - 1.0),
                 axis=1, keepdims=True)                                    # (B, 1)

    # z-conditioning of NeRF layer 1, already duplicated for [surface | air]
    zc = jnp.dot(z, M[128:160, 0:128],
                 preferred_element_type=f32) + V[3:4, 0:128]               # (B, 128)

    # single packed output slab: [h_n(32) | z(32) | kl bcast(32) | z_cond(128)]
    kl_b = jnp.broadcast_to(kl, (kl.shape[0], 32))
    out_ref[...] = jnp.concatenate([h_n, z, kl_b, zc], axis=1)             # (B, 224)


def run_gru_head(bg_enc, q_h, eps, mats, vecs):
    B = bg_enc.shape[0]
    return pl.pallas_call(
        gru_head_kernel,
        out_shape=jax.ShapeDtypeStruct((B, 224), jnp.float32),
        in_specs=[_vmem()] * 5,
        out_specs=_vmem(),
    )(bg_enc, q_h, eps, mats, vecs)


# ----------------------------------------------------------------------------
# Kernel 2: synthetic nerf.forward_bg, channel-major, gridded over (batch, tiles)
# ----------------------------------------------------------------------------
def nerf_bg_kernel(x_ref, zc_ref, w9_ref, w128_ref, bv_ref, y_ref):
    f32 = jnp.float32
    bf16 = jnp.bfloat16

    x = x_ref[0]                           # (9, TM)  bf16  [p_s|p_a|ray] channels
    zc = zc_ref[0]                         # (128, 1) f32   z @ W1z + b1 (both trunks)

    w9 = w9_ref[...]                       # (136, 9)   bf16
    w1T = w9[0:128, :]                     # (128, 9)   layer-1 both trunks
    wrT = w9[128:136, :]                   # (8, 9)     ray skip -> rgb head
    w128 = w128_ref[...]                   # (136, 128) bf16
    w2T = w128[0:128, :]                   # (128, 128) block-diag layer 2
    whT = w128[128:136, :]                 # (8, 128)   fused heads
    bv = bv_ref[...]                       # (136, 1)   f32
    b2 = bv[0:128, :]                      # (128, 1)
    bh = bv[128:136, :]                    # (8, 1)

    # layer 1: (128,9)@(9,TM) -> [h1_surface(64) ; h1_air(64)] x TM points
    h1 = jax.nn.relu(jnp.dot(w1T, x, preferred_element_type=f32) + zc)
    # layer 2: block-diagonal keeps trunks independent, one lane-dense matmul
    h2 = jax.nn.relu(jnp.dot(w2T, h1.astype(bf16),
                             preferred_element_type=f32) + b2)             # (128, TM)

    # fused heads: rows = [rgb(3) | logit_surf | logit_air | pad(3)]
    pre = (jnp.dot(whT, h2.astype(bf16), preferred_element_type=f32)
           + jnp.dot(wrT, x, preferred_element_type=f32)
           + bh)                                                           # (8, TM)
    row = jax.lax.broadcasted_iota(jnp.int32, pre.shape, 0)
    y = jnp.where(row < 3, jax.nn.sigmoid(pre), pre)
    y = jnp.where(row < 5, y, 0.0)         # zero the pad rows (no garbage in slab)
    y_ref[0] = y                           # lane-dense (8, TM) store


def _plan_tiles(n, cap=4096):
    """Pick a point-tile size (multiple of 128) and the padded point count."""
    n128 = max(128, ((n + 127) // 128) * 128)
    tm = min(cap, n128)
    # keep >=2 point tiles when possible so both v7x TensorCores get work
    if n128 // tm < 2 and n128 >= 256:
        tm = max(128, ((n128 // 2) // 128) * 128)
    n_pad = ((n128 + tm - 1) // tm) * tm
    return tm, n_pad


def run_nerf_bg(pts_cm, zc_col, w9_slab, w128_slab, bv_slab, tm):
    B, _, Np = pts_cm.shape
    grid = (B, Np // tm)
    return pl.pallas_call(
        nerf_bg_kernel,
        out_shape=jax.ShapeDtypeStruct((B, 8, Np), jnp.float32),
        grid=grid,
        in_specs=[
            pl.BlockSpec((1, 9, tm), lambda b, i: (b, 0, i)),     # packed points
            pl.BlockSpec((1, 128, 1), lambda b, i: (b, 0, 0)),    # per-batch z-cond
            pl.BlockSpec((136, 9), lambda b, i: (0, 0)),          # W slab (9-in)
            pl.BlockSpec((136, 128), lambda b, i: (0, 0)),        # W slab (128-in)
            pl.BlockSpec((136, 1), lambda b, i: (0, 0)),          # bias slab
        ],
        out_specs=pl.BlockSpec((1, 8, tm), lambda b, i: (b, 0, i)),
        compiler_params=pltpu.CompilerParams(
            dimension_semantics=("parallel", "parallel"),
            vmem_limit_bytes=32 * 1024 * 1024),
    )(pts_cm, zc_col, w9_slab, w128_slab, bv_slab)


# ----------------------------------------------------------------------------
# Background.forward (first timestep after init_his: p_z = N(0, 1))
# ----------------------------------------------------------------------------
def background_forward(params, p_eval_surface, p_eval_air, ray, bg_enc, q_h, eps):
    B, N, _ = ray.shape

    slab = run_gru_head(bg_enc, q_h, eps,
                        params["k1_mats"], params["k1_vecs"])   # (B, 224)
    q_h_n = slab[:, 0:32]
    z = slab[:, 32:64]
    kl = slab[:, 64]                                            # (B,)
    z_cond = slab[:, 96:224]                                    # (B, 128)

    # pack points channel-major (B, 9, Np) in one shot; bf16 halves the DMA
    tm, n_pad = _plan_tiles(N)
    pts = jnp.concatenate([p_eval_surface, p_eval_air, ray], axis=-1)   # (B, N, 9)
    pts = jnp.swapaxes(pts, 1, 2)                                       # (B, 9, N)
    if n_pad != N:
        pts = jnp.pad(pts, ((0, 0), (0, 0), (0, n_pad - N)))
    pts = pts.astype(jnp.bfloat16)
    zc_col = z_cond.reshape(B, 128, 1)

    y = run_nerf_bg(pts, zc_col, params["w9_slab"], params["w128_slab"],
                    params["bv_slab"], tm)                              # (B, 8, n_pad)
    y = y[:, :, :N]
    rgb = jnp.swapaxes(y[:, 0:3, :], 1, 2)[:, None]                     # (B,1,N,3)
    logits_surface = jnp.swapaxes(y[:, 3:4, :], 1, 2)[:, None]          # (B,1,N,1)
    logits_air = jnp.swapaxes(y[:, 4:5, :], 1, 2)[:, None]              # (B,1,N,1)

    out = dict(
        rgb=rgb,
        logits_surface=logits_surface,
        logits_air=logits_air,
        z=z,                                   # (B, 32)
        kl=kl,                                 # (B,)
        q_h_n=q_h_n,                           # (B, 32) new history entry
    )
    return out


# ----------------------------------------------------------------------------
# Deterministic parameter init (shapes from Background.__init__) + packing
# ----------------------------------------------------------------------------
def init_params(key):
    ks = jax.random.split(key, 20)
    s = 0.1
    f32 = jnp.float32
    bf16 = jnp.bfloat16

    # GRUCell(64, 32): gate-stacked [r | u | n] columns, pre-transposed (in, 3H).
    # NOTE: real PyTorch checkpoints store row-stacked [r|z|n] of shape (3H, in);
    # they must be transposed/reordered into this layout before packing.
    gru_wi = jax.random.normal(ks[0], (64, 96), f32) * s
    gru_wh = jax.random.normal(ks[1], (32, 96), f32) * s
    gru_bi = jax.random.normal(ks[2], (96,), f32) * s
    gru_bh = jax.random.normal(ks[3], (96,), f32) * s
    # q_z_net = MLP(32, 32, 64); second layer output = [mu | sigma_pre]
    q_w1 = jax.random.normal(ks[4], (32, 32), f32) * s
    q_b1 = jax.random.normal(ks[5], (32,), f32) * s
    q_w2 = jax.random.normal(ks[6], (32, 64), f32) * s
    q_b2 = jax.random.normal(ks[7], (64,), f32) * s
    q_h0 = jax.random.normal(ks[8], (1, 32), f32) * s

    # synthetic nerf.forward_bg primitive weights
    d_w1p = jax.random.normal(ks[10], (3, 64), f32) * s
    d_w1z = jax.random.normal(ks[11], (32, 64), f32) * s
    d_b1 = jax.random.normal(ks[12], (64,), f32) * s
    d_w2 = jax.random.normal(ks[13], (64, 64), f32) * s
    d_b2 = jax.random.normal(ks[14], (64,), f32) * s
    d_wsig = jax.random.normal(ks[15], (64,), f32) * s
    d_bsig = jax.random.normal(ks[16], (), f32) * s
    d_wrgb_f = jax.random.normal(ks[17], (64, 3), f32) * s
    d_wrgb_r = jax.random.normal(ks[18], (3, 3), f32) * s
    d_brgb = jax.random.normal(ks[19], (3,), f32) * s

    # ---- kernel 1 packed parameter slabs (2 DMA streams) ----
    w1z_both = jnp.concatenate([d_w1z, d_w1z], axis=1)            # (32, 128)
    b1_both = jnp.concatenate([d_b1, d_b1])                       # (128,)
    mats = jnp.zeros((160, 192), f32)
    mats = mats.at[0:64, 0:96].set(gru_wi)        # [x|h] rows: x part -> gi cols
    mats = mats.at[64:96, 96:192].set(gru_wh)     # h part -> gh cols
    mats = mats.at[96:128, 0:32].set(q_w1)
    mats = mats.at[96:128, 32:96].set(q_w2)
    mats = mats.at[128:160, 0:128].set(w1z_both)
    vecs = jnp.zeros((8, 192), f32)
    vecs = vecs.at[0, 0:96].set(gru_bi)
    vecs = vecs.at[0, 96:192].set(gru_bh)
    vecs = vecs.at[1, 0:32].set(q_b1)
    vecs = vecs.at[2, 0:64].set(q_b2)
    vecs = vecs.at[3, 0:128].set(b1_both)

    # ---- kernel 2 packed decoder slabs (channel-major / pre-transposed) ----
    w1T_both = jnp.zeros((128, 9), f32)
    w1T_both = w1T_both.at[0:64, 0:3].set(d_w1p.T)     # surface trunk <- channels 0:3
    w1T_both = w1T_both.at[64:128, 3:6].set(d_w1p.T)   # air trunk     <- channels 3:6
    wrT = jnp.zeros((8, 9), f32).at[0:3, 6:9].set(d_wrgb_r.T)   # ray skip -> rgb
    w9_slab = jnp.concatenate([w1T_both, wrT], axis=0).astype(bf16)      # (136, 9)

    w2T_block = jnp.zeros((128, 128), f32)
    w2T_block = w2T_block.at[0:64, 0:64].set(d_w2.T)
    w2T_block = w2T_block.at[64:128, 64:128].set(d_w2.T)
    whT = jnp.zeros((8, 128), f32)
    whT = whT.at[0:3, 0:64].set(d_wrgb_f.T)            # rgb from surface trunk
    whT = whT.at[3, 0:64].set(d_wsig)                  # logit_surface
    whT = whT.at[4, 64:128].set(d_wsig)                # logit_air from air trunk
    w128_slab = jnp.concatenate([w2T_block, whT], axis=0).astype(bf16)   # (136, 128)

    b2_both = jnp.concatenate([d_b2, d_b2])            # (128,)
    b_head = (jnp.zeros((8,), f32)
              .at[0:3].set(d_brgb).at[3].set(d_bsig).at[4].set(d_bsig))
    bv_slab = jnp.concatenate([b2_both, b_head]).reshape(136, 1)         # (136, 1) f32

    return {
        "k1_mats": mats,
        "k1_vecs": vecs,
        "w9_slab": w9_slab,
        "w128_slab": w128_slab,
        "bv_slab": bv_slab,
        "q_h0": q_h0,           # init_his repeats it to (B, 32)
    }


if __name__ == "__main__":
    B, N = 2, 16
    key = jax.random.PRNGKey(0)
    k_in, k_par, k_eps = jax.random.split(key, 3)
    k1, k2, k3, k4 = jax.random.split(k_in, 4)

    p_eval_surface = jax.random.normal(k1, (B, N, 3), jnp.float32)
    p_eval_air = jax.random.normal(k2, (B, N, 3), jnp.float32)
    ray = jax.random.normal(k3, (B, N, 3), jnp.float32)
    bg_enc = jax.random.normal(k4, (B, 64), jnp.float32)

    params = init_params(k_par)
    q_h = jnp.repeat(params["q_h0"], B, axis=0)               # init_his
    eps = jax.random.normal(k_eps, (B, 32), jnp.float32)      # rsample noise

    out = background_forward(params, p_eval_surface, p_eval_air, ray,
                             bg_enc, q_h, eps)
    jax.block_until_ready(out)

    assert out["rgb"].shape == (B, 1, N, 3)
    assert out["logits_surface"].shape == (B, 1, N, 1)
    assert out["logits_air"].shape == (B, 1, N, 1)
    assert out["z"].shape == (B, 32)
    assert out["kl"].shape == (B,)
    assert out["q_h_n"].shape == (B, 32)
    print("KERNEL_OK")
</pallas_src>

<mosaic_0001>
module attributes {stable_mosaic.version = 11 : i64} {
  func.func @gru_head_kernel(%arg0: memref<2x64xf32, #tpu.memory_space<vmem>>, %arg1: memref<2x32xf32, #tpu.memory_space<vmem>>, %arg2: memref<2x32xf32, #tpu.memory_space<vmem>>, %arg3: memref<160x192xf32, #tpu.memory_space<vmem>>, %arg4: memref<8x192xf32, #tpu.memory_space<vmem>>, %arg5: memref<2x224xf32, #tpu.memory_space<vmem>>) attributes {dimension_semantics = [], scalar_prefetch = 0 : i64, scratch_operands = 0 : i64, tpu.core_type = #tpu.core_type<tc>} {
    %c0 = arith.constant 0 : index
    %c0_0 = arith.constant 0 : index
    %0 = vector.load %arg0[%c0, %c0_0] : memref<2x64xf32, #tpu.memory_space<vmem>>, vector<2x64xf32>
    %c0_1 = arith.constant 0 : index
    %c0_2 = arith.constant 0 : index
    %1 = vector.load %arg1[%c0_1, %c0_2] : memref<2x32xf32, #tpu.memory_space<vmem>>, vector<2x32xf32>
    %c0_3 = arith.constant 0 : index
    %c0_4 = arith.constant 0 : index
    %2 = vector.load %arg3[%c0_3, %c0_4] : memref<160x192xf32, #tpu.memory_space<vmem>>, vector<160x192xf32>
    %c0_5 = arith.constant 0 : index
    %c0_6 = arith.constant 0 : index
    %3 = vector.load %arg4[%c0_5, %c0_6] : memref<8x192xf32, #tpu.memory_space<vmem>>, vector<8x192xf32>
    %4 = tpu.concatenate %0, %1 in 1 : vector<2x64xf32>, vector<2x32xf32> -> vector<2x96xf32>
    %5 = vector.extract_strided_slice %2 {offsets = [0, 0], sizes = [96, 192], strides = [1, 1]} : vector<160x192xf32> to vector<96x192xf32>
    %cst = arith.constant dense<0.000000e+00> : vector<2x192xf32>
    %6 = tpu.matmul %4, %5, %cst {dimension_numbers = #tpu.dot_dimension_numbers<[1], [0], [0], [1], [0, 0, 1, 1], [], []>} : vector<2x96xf32>, vector<96x192xf32>, vector<2x192xf32> -> vector<2x192xf32>
    %7 = vector.extract_strided_slice %3 {offsets = [0, 0], sizes = [1, 192], strides = [1, 1]} : vector<8x192xf32> to vector<1x192xf32>
    %8 = vector.broadcast %7 : vector<1x192xf32> to vector<2x192xf32>
    %9 = arith.addf %6, %8 : vector<2x192xf32>
    %10 = vector.extract_strided_slice %9 {offsets = [0, 0], sizes = [2, 96], strides = [1, 1]} : vector<2x192xf32> to vector<2x96xf32>
    %11 = vector.extract_strided_slice %9 {offsets = [0, 96], sizes = [2, 96], strides = [1, 1]} : vector<2x192xf32> to vector<2x96xf32>
    %12 = vector.extract_strided_slice %10 {offsets = [0, 0], sizes = [2, 32], strides = [1, 1]} : vector<2x96xf32> to vector<2x32xf32>
    %13 = vector.extract_strided_slice %11 {offsets = [0, 0], sizes = [2, 32], strides = [1, 1]} : vector<2x96xf32> to vector<2x32xf32>
    %14 = arith.addf %12, %13 : vector<2x32xf32>
    %15 = arith.negf %14 : vector<2x32xf32>
    %16 = math.exp %15 : vector<2x32xf32>
    %cst_7 = arith.constant 1.000000e+00 : f32
    %17 = vector.broadcast %cst_7 : f32 to vector<2x32xf32>
    %18 = arith.addf %17, %16 : vector<2x32xf32>
    %19 = arith.divf %17, %18 : vector<2x32xf32>
    %20 = vector.extract_strided_slice %10 {offsets = [0, 32], sizes = [2, 32], strides = [1, 1]} : vector<2x96xf32> to vector<2x32xf32>
    %21 = vector.extract_strided_slice %11 {offsets = [0, 32], sizes = [2, 32], strides = [1, 1]} : vector<2x96xf32> to vector<2x32xf32>
    %22 = arith.addf %20, %21 : vector<2x32xf32>
    %23 = arith.negf %22 : vector<2x32xf32>
    %24 = math.exp %23 : vector<2x32xf32>
    %cst_8 = arith.constant 1.000000e+00 : f32
    %25 = vector.broadcast %cst_8 : f32 to vector<2x32xf32>
    %26 = arith.addf %25, %24 : vector<2x32xf32>
    %27 = arith.divf %25, %26 : vector<2x32xf32>
    %28 = vector.extract_strided_slice %10 {offsets = [0, 64], sizes = [2, 32], strides = [1, 1]} : vector<2x96xf32> to vector<2x32xf32>
    %29 = vector.extract_strided_slice %11 {offsets = [0, 64], sizes = [2, 32], strides = [1, 1]} : vector<2x96xf32> to vector<2x32xf32>
    %30 = arith.mulf %19, %29 : vector<2x32xf32>
    %31 = arith.addf %28, %30 : vector<2x32xf32>
    %32 = math.tanh %31 : vector<2x32xf32>
    %cst_9 = arith.constant 1.000000e+00 : f32
    %33 = vector.broadcast %cst_9 : f32 to vector<2x32xf32>
    %34 = arith.subf %33, %27 : vector<2x32xf32>
    %35 = arith.mulf %34, %32 : vector<2x32xf32>
    %36 = arith.mulf %27, %1 : vector<2x32xf32>
    %37 = arith.addf %35, %36 : vector<2x32xf32>
    %38 = vector.extract_strided_slice %2 {offsets = [96, 0], sizes = [32, 32], strides = [1, 1]} : vector<160x192xf32> to vector<32x32xf32>
    %cst_10 = arith.constant dense<0.000000e+00> : vector<2x32xf32>
    %39 = tpu.matmul %37, %38, %cst_10 {dimension_numbers = #tpu.dot_dimension_numbers<[1], [0], [0], [1], [0, 0, 1, 1], [], []>} : vector<2x32xf32>, vector<32x32xf32>, vector<2x32xf32> -> vector<2x32xf32>
    %40 = vector.extract_strided_slice %3 {offsets = [1, 0], sizes = [1, 32], strides = [1, 1]} : vector<8x192xf32> to vector<1x32xf32>
    %41 = vector.broadcast %40 : vector<1x32xf32> to vector<2x32xf32>
    %42 = arith.addf %39, %41 : vector<2x32xf32>
    %cst_11 = arith.constant 0.000000e+00 : f32
    %43 = vector.broadcast %cst_11 : f32 to vector<2x32xf32>
    %44 = arith.maximumf %42, %43 : vector<2x32xf32>
    %45 = vector.extract_strided_slice %2 {offsets = [96, 32], sizes = [32, 64], strides = [1, 1]} : vector<160x192xf32> to vector<32x64xf32>
    %cst_12 = arith.constant dense<0.000000e+00> : vector<2x64xf32>
    %46 = tpu.matmul %44, %45, %cst_12 {dimension_numbers = #tpu.dot_dimension_numbers<[1], [0], [0], [1], [0, 0, 1, 1], [], []>} : vector<2x32xf32>, vector<32x64xf32>, vector<2x64xf32> -> vector<2x64xf32>
    %47 = vector.extract_strided_slice %3 {offsets = [2, 0], sizes = [1, 64], strides = [1, 1]} : vector<8x192xf32> to vector<1x64xf32>
    %48 = vector.broadcast %47 : vector<1x64xf32> to vector<2x64xf32>
    %49 = arith.addf %46, %48 : vector<2x64xf32>
    %50 = vector.extract_strided_slice %49 {offsets = [0, 0], sizes = [2, 32], strides = [1, 1]} : vector<2x64xf32> to vector<2x32xf32>
    %51 = vector.extract_strided_slice %49 {offsets = [0, 32], sizes = [2, 32], strides = [1, 1]} : vector<2x64xf32> to vector<2x32xf32>
    %cst_13 = arith.constant 0.000000e+00 : f32
    %52 = vector.broadcast %cst_13 : f32 to vector<2x32xf32>
    %53 = arith.maximumf %51, %52 : vector<2x32xf32>
    %54 = vector.broadcast %cst_13 : f32 to vector<2x32xf32>
    %55 = arith.subf %51, %54 : vector<2x32xf32>
    %56 = arith.cmpf one, %55, %55 : vector<2x32xf32>
    %57 = vector.broadcast %cst_13 : f32 to vector<2x32xf32>
    %58 = arith.addf %51, %57 : vector<2x32xf32>
    %59 = math.absf %55 : vector<2x32xf32>
    %cst_14 = arith.constant 0.000000e+00 : f32
    %60 = vector.broadcast %cst_14 : f32 to vector<2x32xf32>
    %61 = arith.subf %60, %59 : vector<2x32xf32>
    %62 = math.exp %61 : vector<2x32xf32>
    %63 = math.log1p %62 : vector<2x32xf32>
    %64 = arith.addf %53, %63 : vector<2x32xf32>
    %65 = arith.select %56, %58, %64 : vector<2x32xi1>, vector<2x32xf32>
    %cst_15 = arith.constant 9.99999974E-5 : f32
    %66 = vector.broadcast %cst_15 : f32 to vector<2x32xf32>
    %67 = arith.addf %65, %66 : vector<2x32xf32>
    %c0_16 = arith.constant 0 : index
    %c0_17 = arith.constant 0 : index
    %68 = vector.load %arg2[%c0_16, %c0_17] : memref<2x32xf32, #tpu.memory_space<vmem>>, vector<2x32xf32>
    %69 = arith.mulf %67, %68 : vector<2x32xf32>
    %70 = arith.addf %50, %69 : vector<2x32xf32>
    %71 = math.log %67 : vector<2x32xf32>
    %cst_18 = arith.constant 0.000000e+00 : f32
    %72 = vector.broadcast %cst_18 : f32 to vector<2x32xf32>
    %73 = arith.subf %72, %71 : vector<2x32xf32>
    %74 = arith.mulf %67, %67 : vector<2x32xf32>
    %75 = arith.mulf %50, %50 : vector<2x32xf32>
    %76 = arith.addf %74, %75 : vector<2x32xf32>
    %cst_19 = arith.constant 1.000000e+00 : f32
    %77 = vector.broadcast %cst_19 : f32 to vector<2x32xf32>
    %78 = arith.subf %76, %77 : vector<2x32xf32>
    %cst_20 = arith.constant 5.000000e-01 : f32
    %79 = vector.broadcast %cst_20 : f32 to vector<2x32xf32>
    %80 = arith.mulf %79, %78 : vector<2x32xf32>
    %81 = arith.addf %73, %80 : vector<2x32xf32>
    %cst_21 = arith.constant dense<0.000000e+00> : vector<2xf32>
    %82 = vector.multi_reduction <add>, %81, %cst_21 [1] : vector<2x32xf32> to vector<2xf32>
    %83 = vector.shape_cast %82 : vector<2xf32> to vector<2x1xf32>
    %84 = vector.extract_strided_slice %2 {offsets = [128, 0], sizes = [32, 128], strides = [1, 1]} : vector<160x192xf32> to vector<32x128xf32>
    %cst_22 = arith.constant dense<0.000000e+00> : vector<2x128xf32>
    %85 = tpu.matmul %70, %84, %cst_22 {dimension_numbers = #tpu.dot_dimension_numbers<[1], [0], [0], [1], [0, 0, 1, 1], [], []>} : vector<2x32xf32>, vector<32x128xf32>, vector<2x128xf32> -> vector<2x128xf32>
    %86 = vector.extract_strided_slice %3 {offsets = [3, 0], sizes = [1, 128], strides = [1, 1]} : vector<8x192xf32> to vector<1x128xf32>
    %87 = vector.broadcast %86 : vector<1x128xf32> to vector<2x128xf32>
    %88 = arith.addf %85, %87 : vector<2x128xf32>
    %89 = vector.shape_cast %83 : vector<2x1xf32> to vector<2x1xf32>
    %90 = vector.broadcast %89 : vector<2x1xf32> to vector<2x32xf32>
    %91 = tpu.concatenate %37, %70, %90, %88 in 1 : vector<2x32xf32>, vector<2x32xf32>, vector<2x32xf32>, vector<2x128xf32> -> vector<2x224xf32>
    %c0_23 = arith.constant 0 : index
    %c0_24 = arith.constant 0 : index
    %92 = vector.load %arg5[%c0_23, %c0_24] : memref<2x224xf32, #tpu.memory_space<vmem>>, vector<2x224xf32>
    tpu.vector_store %arg5[%c0_23, %c0_24], %91 {strides = array<i32>} : memref<2x224xf32, #tpu.memory_space<vmem>>, vector<2x224xf32>,
    return
  }
}

</mosaic_0001>

<bundles_post_ra>
// kernel: tpu_custom_call.1
= control target key start
LH: loop header
LB: loop body
LE: loop exit
PB: predicated region body
PF: predicated region fallthrough
CT: control target
= control target key end

     0   :  { %10 = vsyncpa [#allocation3], 0  ;;  %s954_s0 = inlined_call_operand.hbm [shape: f32[2,64], index: 0, kind: input, shape index: {}]   ;;  %s955_s1 = inlined_call_operand.vmem [shape: f32[2,32], index: 1, kind: input, shape index: {}]   ;;  %s956_s2 = inlined_call_operand.vmem [shape: f32[2,32], index: 2, kind: input, shape index: {}]   ;;  %s957_s3 = inlined_call_operand.hbm [shape: f32[160,192], index: 3, kind: input, shape index: {}]   ;;  %s958_s4 = inlined_call_operand.hbm [shape: f32[8,192], index: 4, kind: input, shape index: {}]   ;;  %s959_s5 = inlined_call_operand.hbm [shape: f32[2,224], index: 5, kind: output, shape index: {}]  }
   0x1   :  { %11 = vsyncpa [#allocation6], 0 }
   0x2   :  { %12 = vsyncpa [#allocation4], 0  ;;  %s799_s18 = smov [#allocation5]   ;;  %s705_s22 = scalar_lea.hbm %s957_s3, 5120 }
   0x3   :  { %s32_s19 = sshll.u32 %s799_s18, 4  ;;  %p706_p0 = scmp.ne.s32.totalorder %s957_s3, %s705_s22  ;;  %s33_s19 = int_to_ptr.vmem [resolvable:$true] %s32_s19 }
   0x4   :  { %p709_p1 = scmp.lt.u32.totalorder %s705_s22, %s957_s3 }
   0x6   :  { %p711_p2 = pnand %p709_p1, %p706_p0 }
   0x8   :  { %714 = shalt.err (!%p711_p2)
}
   0x9   :  { %s715_s27 = scalar_lea.vmem %s33_s19, 5120  ;;  %p720_p4 = scmp.lt.s32.totalorder %s33_s19, %s33_s19 }
   0xa   :  { %p716_p3 = scmp.ne.s32.totalorder %s33_s19, %s715_s27  ;;  %p721_p5 = scmp.lt.s32.totalorder %s715_s27, %s715_s27 }
   0xc   :  { %p722_p6 = por %p721_p5, %p720_p4 }
   0xe   :  { %p723_p7 = pnand %p722_p6, %p716_p3 }
  0x10   :  { %726 = shalt.err (!%p723_p7)
}
  0x11   :  { %s800_s28 = smov 256   ;;  %s801_s29 = smov 16  }
  0x12   :  { %38 = dma.hbm_to_vmem [thread:$0]  %s957_s3, 5120, %s33_s19, [#allocation6], %s800_s28, %s800_s28, %s801_s29  }
  0x13   :  { %s802_s7 = smov [#allocation2]   ;;  %s803_s9 = smov [#allocation7]  }
  0x14   :  { %s19_s8 = sshll.u32 %s802_s7, 4  ;;  %s45_s10 = sshll.u32 %s803_s9, 4  ;;  %s20_s8 = int_to_ptr.vmem [resolvable:$true] %s19_s8  ;;  %s46_s10 = int_to_ptr.vmem [resolvable:$true] %s45_s10 }
  0x15   :  { %s727_s13 = scalar_lea.hbm %s954_s0, 32 }
  0x16   :  { %p728_p8 = scmp.ne.s32.totalorder %s954_s0, %s727_s13  ;;  %p731_p9 = scmp.lt.u32.totalorder %s727_s13, %s954_s0 }
  0x18   :  { %p733_p10 = pnand %p731_p9, %p728_p8 }
  0x1a   :  { %736 = shalt.err (!%p733_p10)
}
  0x1b   :  { %s737_s3 = scalar_lea.vmem %s20_s8, 32  ;;  %p742_p12 = scmp.lt.s32.totalorder %s20_s8, %s20_s8 }
  0x1c   :  { %p738_p11 = scmp.ne.s32.totalorder %s20_s8, %s737_s3  ;;  %p743_p13 = scmp.lt.s32.totalorder %s737_s3, %s737_s3 }
  0x1e   :  { %p744_p0 = por %p743_p13, %p742_p12 }
  0x20   :  { %p745_p1 = pnand %p744_p0, %p738_p11 }
  0x22   :  { %748 = shalt.err (!%p745_p1)
}
  0x23   :  { %22 = dma.hbm_to_vmem [thread:$0]  %s954_s0, 32, %s20_s8, [#allocation3]  }
  0x24   :  { %s749_s22 = scalar_lea.hbm %s958_s4, 256 }
  0x25   :  { %p750_p2 = scmp.ne.s32.totalorder %s958_s4, %s749_s22  ;;  %p753_p3 = scmp.lt.u32.totalorder %s749_s22, %s958_s4 }
  0x27   :  { %p755_p4 = pnand %p753_p3, %p750_p2 }
  0x29   :  { %758 = shalt.err (!%p755_p4)
}
  0x2a   :  { %s759_s27 = scalar_lea.vmem %s46_s10, 256  ;;  %p764_p6 = scmp.lt.s32.totalorder %s46_s10, %s46_s10 }
  0x2b   :  { %p760_p5 = scmp.ne.s32.totalorder %s46_s10, %s759_s27  ;;  %p765_p7 = scmp.lt.s32.totalorder %s759_s27, %s759_s27 }
  0x2d   :  { %p766_p8 = por %p765_p7, %p764_p6 }
  0x2f   :  { %p767_p9 = pnand %p766_p8, %p760_p5 }
  0x31   :  { %770 = shalt.err (!%p767_p9)
}
  0x32   :  { %48 = dma.hbm_to_vmem [thread:$0]  %s958_s4, 256, %s46_s10, [#allocation6]  }
  0x33   :  { %793 = dma.done.wait [#allocation3], 32  }
  0x34   :  { %794 = vsyncadd [#allocation3], 4294967264 }
  0x35   :  { %795 = dma.done.wait [#allocation6], 5376  }
  0x36   :  { %796 = vsyncadd [#allocation6], 4294961920  ;;  %v804_v0 = vmov 0.0   ;;  %v882_v1 = vld [vmem:[%s955_s1] sm:$0x3]  ;;  %v61_v2 = vld [vmem:[#allocation5 + $0x8] sm:$0xff]  ;;  %v100_v41 = vlaneseq }
  0x37   :  { %176 = vmatprep.mubr.f32.mxu0 %v804_v0  ;;  %v63_v3 = vld [vmem:[#allocation5 + $0x18] sm:$0xff]  ;;  %s805_s6 = smov 64   ;;  %v60_v5 = vld [vmem:[#allocation5] sm:$0xff]  ;;  %v62_v6 = vld [vmem:[#allocation5 + $0x10] sm:$0xff]  ;;  %vm98_vm0 = vcmask 523264   ;;  %vm108_vm1 = vcmask 785408  }
  0x38   :  { %95 = vrot.lane.b32.xlu0 %v882_v1, %s805_s6  ;;  %v624_v4 = vpack.c.bf16 %v63_v3, %v61_v2  ;;  %v65_v7 = vld [vmem:[#allocation5 + $0x28] sm:$0xff]  ;;  %v626_v8 = vpack.c.bf16 %v62_v6, %v60_v5  ;;  %v67_v9 = vld [vmem:[#allocation5 + $0x38] sm:$0xff]  ;;  %v64_v10 = vld [vmem:[#allocation5 + $0x20] sm:$0xff]  ;;  %v888_v42 = vshrl.u32 %v100_v41, 7  ;;  %s806_s1 = smov 32   ;;  %s807_s4 = smov 96  }
  0x39   :  { %v66_v11 = vld [vmem:[#allocation5 + $0x30] sm:$0xff]  ;;  %v628_v12 = vpack.c.bf16 %v67_v9, %v65_v7  ;;  %v69_v13 = vld [vmem:[#allocation5 + $0x48] sm:$0xff]  ;;  %v71_v14 = vld [vmem:[#allocation5 + $0x58] sm:$0xff]  ;;  %v808_v3 = vmov 0.0|0.0   ;;  %vm809_vm2 = vmmov 0   ;;  %vm233_vm3 = vcmask 261120  }
  0x3a   :  { %625 = vmatprep.subr.bf16.mxu0 %v624_v4  ;;  %v630_v15 = vpack.c.bf16 %v66_v11, %v64_v10  ;;  %v632_v16 = vpack.c.bf16 %v71_v14, %v69_v13  ;;  %v68_v17 = vld [vmem:[#allocation5 + $0x40] sm:$0xff]  ;;  %v70_v18 = vld [vmem:[#allocation5 + $0x50] sm:$0xff]  ;;  %v73_v19 = vld [vmem:[#allocation5 + $0x68] sm:$0xff]  ;;  %v102_v43 = vsub.s32 0, %v888_v42  ;;  %648 = vmatprep.subr.bf16.mxu1 %v808_v3  ;;  %vm447_vm6 = vcmask 254976  }
  0x3b   :  { %627 = vmatpush1.bf16.msra.mxu0 %v626_v8  ;;  %v75_v20 = vld [vmem:[#allocation5 + $0x78] sm:$0xff]  ;;  %v634_v21 = vpack.c.bf16 %v70_v18, %v68_v17  ;;  %v72_v23 = vld [vmem:[#allocation5 + $0x60] sm:$0xff]  ;;  %v74_v24 = vld [vmem:[#allocation5 + $0x70] sm:$0xff]  ;;  %599 = vmatprep.mubr.msk.f32.mxu1 %vm809_vm2, %v804_v0  ;;  %vm549_vm7 = vcmask 1041408   ;;  %vm550_vm8 = vcmask 781314  }
  0x3c   :  { %629 = vmatprep.subr.bf16.mxu0 %v628_v12  ;;  %v636_v22 = vpack.c.bf16 %v75_v20, %v73_v19  ;;  %v77_v25 = vld [vmem:[#allocation5 + $0x88] sm:$0xff]  ;;  %v79_v26 = vld [vmem:[#allocation5 + $0x98] sm:$0xff]  ;;  %v638_v27 = vpack.c.bf16 %v74_v24, %v72_v23  ;;  %v76_v29 = vld [vmem:[#allocation5 + $0x80] sm:$0xff] }
  0x3d   :  { %v640_v28 = vpack.c.bf16 %v79_v26, %v77_v25  ;;  %v78_v30 = vld [vmem:[#allocation5 + $0x90] sm:$0xff]  ;;  %v81_v31 = vld [vmem:[#allocation5 + $0xa8] sm:$0xff]  ;;  %v83_v32 = vld [vmem:[#allocation5 + $0xb8] sm:$0xff] }
  0x3e   :  { %v642_v33 = vpack.c.bf16 %v78_v30, %v76_v29  ;;  %v644_v34 = vpack.c.bf16 %v83_v32, %v81_v31  ;;  %v80_v35 = vld [vmem:[#allocation5 + $0xa0] sm:$0xff]  ;;  %v82_v36 = vld [vmem:[#allocation5 + $0xb0] sm:$0xff]  ;;  %v58_v38 = vld [vmem:[#allocation2] sm:$0x3]  ;;  %v228_v31 = vsub.s32 1, %v888_v42 }
  0x3f   :  { %631 = vmatpush1.bf16.msra.mxu0 %v630_v15  ;;  %v646_v37 = vpack.c.bf16 %v82_v36, %v80_v35  ;;  %v891_v44 = vld [vmem:[#allocation7] sm:$0xff]  ;;  %v93_v45 = vld [vmem:[#allocation7 + $0x8] sm:$0xff]  ;;  %v85_v63 = vld [vmem:[#allocation5 + $0xd0] sm:$0xff] }
  0x40   :  { %633 = vmatprep.subr.bf16.mxu0 %v632_v16  ;;  %v103_v46 = vrot.slane %v891_v44, %v102_v43  ;;  %v107_v47 = vrot.slane %v93_v45, %v102_v43  ;;  %v84_v62 = vld [vmem:[#allocation5 + $0xc0] sm:$0xff]  ;;  %v87_v5 = vld [vmem:[#allocation5 + $0xf0] sm:$0xff]  ;;  %v419_v30 = vld [vmem:[%s956_s2] sm:$0x3]  ;;  %v229_v32 = vrot.slane %v891_v44, %v228_v31  ;;  %s811_s2 = smov [#allocation8]  }
  0x41   :  { %v86_v2 = vld [vmem:[#allocation5 + $0xe0] sm:$0xff]  ;;  %v649_v4 = vpack.c.bf16 %v85_v63, %v84_v62  ;;  %v89_v41 = vld [vmem:[#allocation5 + $0x110] sm:$0xff]  ;;  %s559_s9 = sshll.u32 %s811_s2, 4  ;;  %vm551_vm9 = vmor %vm550_vm8, %vm549_vm7  ;;  %s560_s9 = int_to_ptr.vmem [resolvable:$true] %s559_s9 }
  0x42   :  { %v652_v6 = vpack.c.bf16 %v87_v5, %v86_v2  ;;  %v684_v20 = vpack.i.bf16 %v87_v5, %v86_v2  ;;  %v90_v43 = vld [vmem:[#allocation5 + $0x120] sm:$0xff]  ;;  %s771_s10 = scalar_lea.vmem %s560_s9, 64  ;;  %p776_p11 = scmp.lt.s32.totalorder %s560_s9, %s560_s9 }
  0x43   :  { %635 = vmatpush1.bf16.msra.mxu0 %v634_v21  ;;  %650 = vmatpush3.bf16.msra.mxu1 %v649_v4  ;;  %p772_p10 = scmp.ne.s32.totalorder %s560_s9, %s771_s10  ;;  %p777_p12 = scmp.lt.s32.totalorder %s771_s10, %s771_s10 }
  0x44   :  { %637 = vmatprep.subr.bf16.mxu0 %v636_v22  ;;  %651 = vmatprep.subr.bf16.mxu1 %v808_v3 }
  0x45   :  { %p778_p13 = por %p777_p12, %p776_p11 }
  0x47   :  { %639 = vmatpush1.bf16.msra.mxu0 %v638_v27  ;;  %653 = vmatpush3.bf16.msra.mxu1 %v652_v6  ;;  %p779_p0 = pnand %p778_p13, %p772_p10 }
  0x48   :  { %641 = vmatprep.subr.bf16.mxu0 %v640_v28  ;;  %654 = vmatprep.subr.bf16.mxu1 %v808_v3 }
  0x4b   :  { %643 = vmatpush1.bf16.msra.mxu0 %v642_v33 }
  0x4c   :  { %645 = vmatprep.subr.bf16.mxu0 %v644_v34 }
  0x4f   :  { %647 = vmatpush1.bf16.msra.mxu0 %v646_v37  ;;  %v309_v37 = vsub.s32 2, %v888_v42 }
  0xaa   :  { %v96_v39 = vpop.permute.xlu0 %95 }
  0xab   :  { %v99_v40 = vsel %vm98_vm0, %v58_v38, %v96_v39  ;;  %v310_v38 = vrot.slane %v891_v44, %v309_v37 }
  0xac   :  { %569 = vmatmul.mubr.msk.f32.vlgmr.msra.gmra.mrb[0].mxu0 %vm108_vm1, %v99_v40  ;;  %v88_v40 = vld [vmem:[#allocation5 + $0x100] sm:$0xff] }
 0x17f   :  { %v178_v48 = vpop.f32.mrb[0].mxu0 }
 0x180   :  { %v179_v49 = vadd.f32 %v178_v48, %v103_v46  ;;  %v180_v50 = vpop.f32.mrb[1].mxu0  ;;  %v91_v48 = vld [vmem:[#allocation5 + $0x130] sm:$0xff] }
 0x181   :  { %v181_v51 = vadd.f32 %v180_v50, %v107_v47  ;;  %v661_v47 = vpack.c.bf16 %v89_v41, %v88_v40 }
 0x182   :  { %184 = vrot.lane.b32.xlu0 %v179_v49, %s806_s1 }
 0x183   :  { %205 = vrot.lane.b32.xlu1 %v181_v51, %s807_s4 }
 0x186   :  { %195 = vrot.lane.b32.xlu0 %v181_v51, %s806_s1  ;;  %v664_v51 = vpack.c.bf16 %v91_v48, %v90_v43 }
 0x18a   :  { %221 = vrot.lane.b32.xlu0 %v882_v1, %s806_s1  ;;  %v679_v1 = vpack.i.bf16 %v85_v63, %v84_v62 }
 0x18e   :  { %680 = vrot.lane.b32.xlu0 %v679_v1, %s807_s4 }
 0x192   :  { %421 = vrot.lane.b32.xlu0 %v419_v30, %s806_s1 }
 0x1f4   :  { %v185_v52 = vpop.permute.xlu0 %184 }
 0x1f5   :  { %v187_v53 = vadd.f32 %v185_v52, %v179_v49  ;;  %v206_v58 = vpop.permute.xlu1 %205 }
 0x1f7   :  { %v570_v54 = vmul.f32 -1.442695, %v187_v53 }
 0x1f8   :  { %v196_v8 = vpop.permute.xlu0 %195 }
 0x1f9   :  { %689 = vpow2.f32 %v570_v54  ;;  %v198_v9 = vadd.f32 %v196_v8, %v179_v49 }
 0x1fb   :  { %v571_v10 = vmul.f32 -1.442695, %v198_v9 }
 0x1fc   :  { %v222_v14 = vpop.permute.xlu0 %221 }
 0x200   :  { %v681_v21 = vpop.permute.xlu0 %680 }
 0x201   :  { %v683_v22 = vunpack.i.h.bf16 %v681_v21  ;;  %v682_v23 = vunpack.i.l.bf16 %v681_v21 }
 0x203   :  { %v690_v55 = vpop.eup %689  ;;  %v655_v24 = vpack.c.bf16 %v683_v22, %v682_v23  ;;  %v810_v23 = vmov 1983009808  }
 0x204   :  { %v191_v56 = vadd.f32 1.0, %v690_v55  ;;  %v422_v2 = vpop.permute.xlu0 %421 }
 0x206   :  { %691 = vrcp.f32 %v191_v56 }
 0x210   :  { %v692_v57 = vpop.eup %691 }
 0x211   :  { %v208_v59 = vmul.f32 %v692_v57, %v206_v58 }
 0x213   :  { %210 = vrot.lane.b32.xlu1 %v208_v59, %s805_s6 }
 0x285   :  { %v211_v60 = vpop.permute.xlu1 %210 }
 0x286   :  { %v213_v61 = vadd.f32 %v211_v60, %v179_v49 }
 0x288   :  { %693 = vtanh.f32 %v213_v61 }
 0x289   :  { %695 = vpow2.f32 %v571_v10 }
 0x292   :  { %v694_v7 = vpop.eup %693 }
 0x293   :  { %217 = vrot.lane.b32.xlu1 %v694_v7, %s807_s4  ;;  %v696_v11 = vpop.eup %695 }
 0x294   :  { %v202_v12 = vadd.f32 1.0, %v696_v11 }
 0x296   :  { %697 = vrcp.f32 %v202_v12 }
 0x2a0   :  { %v698_v13 = vpop.eup %697 }
 0x2a1   :  { %v215_v15 = vsub.f32 1.0, %v698_v13  ;;  %v224_v17 = vmul.f32 %v698_v13, %v222_v14 }
 0x305   :  { %v218_v16 = vpop.permute.xlu1 %217 }
 0x306   :  { %v220_v18 = vmul.f32 %v218_v16, %v215_v15 }
 0x308   :  { %v225_v19 = vadd.f32 %v224_v17, %v220_v18  ;;  %v453_v18 = vsub.s32 3, %v888_v42 }
 0x30a   :  { %231 = vrot.lane.b32.xlu1 %v225_v19, %s807_s4  ;;  %v454_v19 = vrot.slane %v891_v44, %v453_v18 }
 0x30e   :  { %685 = vrot.lane.b32.xlu1 %v684_v20, %s807_s4 }
 0x37c   :  { %v909_v25 = vpop.permute.xlu1 %231 }
 0x37d   :  { %600 = vmatmul.mubr.msk.f32.vlgmr.msra.gmra.mrb[0].mxu1 %vm233_vm3, %v909_v25 }
 0x37e   :  { %656 = vmatpush3.bf16.msra.mxu1 %v655_v24  ;;  %610 = vmatprep.mubr.msk.f32.mxu1 %vm809_vm2, %v804_v0  ;;  %v542_v24 = vunpack.c.l.s4 %v810_v23 }
 0x37f   :  { %657 = vmatprep.subr.bf16.mxu1 %v808_v3 }
 0x380   :  { %v686_v26 = vpop.permute.xlu1 %685 }
 0x381   :  { %v688_v27 = vunpack.i.h.bf16 %v686_v26  ;;  %v687_v28 = vunpack.i.l.bf16 %v686_v26 }
 0x383   :  { %v658_v29 = vpack.c.bf16 %v688_v27, %v687_v28  ;;  %v543_v27 = vunpack.c.0.s8 %v542_v24 }
 0x385   :  { %659 = vmatpush3.bf16.msra.mxu1 %v658_v29  ;;  %v546_v31 = vsub.s32 %v543_v27, %v888_v42 }
 0x386   :  { %660 = vmatprep.subr.bf16.mxu1 %v808_v3 }
 0x450   :  { %v302_v33 = vpop.f32.mrb[0].mxu1 }
 0x451   :  { %v303_v34 = vadd.f32 %v302_v33, %v229_v32  ;;  %v601_v35 = vpop.f32.mrb[1].mxu1 }
 0x453   :  { %v306_v36 = vmax.f32 %v303_v34, 0.0 }
 0x455   :  { %611 = vmatmul.mubr.msk.f32.vlgmr.msra.gmra.mrb[2].mxu1 %vm233_vm3, %v306_v36 }
 0x456   :  { %621 = vmatprep.mubr.msk.f32.mxu1 %vm809_vm2, %v804_v0  ;;  %662 = vmatpush3.bf16.msra.mxu1 %v661_v47 }
 0x457   :  { %663 = vmatprep.subr.bf16.mxu1 %v808_v3 }
 0x45a   :  { %665 = vmatpush3.bf16.msra.mxu1 %v664_v51 }
 0x528   :  { %v396_v39 = vpop.f32.mrb[2].mxu1 }
 0x529   :  { %v397_v45 = vadd.f32 %v396_v39, %v310_v38  ;;  %v612_v46 = vpop.f32.mrb[3].mxu1 }
 0x52b   :  { %v403_v49 = vand.u32 2147483647, %v397_v45  ;;  %v434_v50 = vmul.f32 %v397_v45, %v397_v45  ;;  %v400_v61 = vmax.f32 %v397_v45, 0.0  ;;  %vm401_vm5 = vcmp.ne.f32.partialorder %v397_v45, %v397_v45 }
 0x52d   :  { %v404_v52 = vsub.f32 0.0, %v403_v49  ;;  %436 = vrot.lane.b32.xlu0 %v434_v50, %s806_s1 }
 0x52f   :  { %v405_v0 = vmul.f32 1.442695, %v404_v52 }
 0x531   :  { %699 = vpow2.f32 %v405_v0 }
 0x53b   :  { %v700_v53 = vpop.eup %699 }
 0x53c   :  { %v407_v54 = vadd.f32 1.0, %v700_v53  ;;  %v410_v55 = vmul.f32 -0.5, %v700_v53  ;;  %v413_v57 = vand.u32 2147483647, %v700_v53 }
 0x53e   :  { %701 = vlog2.f32 %v407_v54  ;;  %v411_v56 = vadd.f32 1.0, %v410_v55  ;;  %vm414_vm4 = vcmp.lt.f32.partialorder %v413_v57, 0.0004427343 }
 0x540   :  { %v412_v60 = vmul.f32 %v700_v53, %v411_v56 }
 0x548   :  { %v702_v58 = vpop.eup %701 }
 0x549   :  { %v409_v59 = vmul.f32 0.6931472, %v702_v58 }
 0x54b   :  { %v415_v62 = vsel %vm414_vm4, %v412_v60, %v409_v59 }
 0x54c   :  { %v416_v63 = vadd.f32 %v415_v62, %v400_v61 }
 0x54e   :  { %v417_v3 = vsel %vm401_vm5, %v397_v45, %v416_v63 }
 0x54f   :  { %v418_v1 = vadd.f32 0.0001, %v417_v3 }
 0x551   :  { %v424_v4 = vmul.f32 %v422_v2, %v418_v1  ;;  %703 = vlog2.f32 %v418_v1  ;;  %v433_v6 = vmul.f32 %v418_v1, %v418_v1 }
 0x553   :  { %426 = vrot.lane.b32.xlu1 %v424_v4, %s807_s4 }
 0x55b   :  { %v704_v5 = vpop.eup %703 }
 0x55c   :  { %v431_v8 = vmul.f32 0.6931472, %v704_v5 }
 0x55e   :  { %v432_v11 = vsub.f32 0.0, %v431_v8 }
 0x59f   :  { %v437_v7 = vpop.permute.xlu0 %436 }
 0x5a0   :  { %v439_v9 = vadd.f32 %v437_v7, %v433_v6 }
 0x5a2   :  { %v574_v10 = vadd.f32 -1.0, %v439_v9 }
 0x5a4   :  { %v441_v12 = vmul.f32 0.5, %v574_v10 }
 0x5a6   :  { %v442_v13 = vadd.f32 %v441_v12, %v432_v11 }
 0x5a8   :  { %444 = vrot.lane.b32.xlu1 %v442_v13, %s807_s4 }
 0x5c5   :  { %v427_v14 = vpop.permute.xlu1 %426 }
 0x5c6   :  { %v429_v15 = vadd.f32 %v427_v14, %v397_v45 }
 0x5c8   :  { %529 = vrot.lane.b32.xlu1 %v429_v15, %s806_s1  ;;  %622 = vmatmul.mubr.msk.f32.vlgmr.msra.gmra.mrb[4].mxu1 %vm233_vm3, %v429_v15 }
 0x61a   :  { %v445_v16 = vpop.permute.xlu1 %444 }
 0x61b   :  { %v448_v17 = vsel %vm447_vm6, %v445_v16, 0.0 }
 0x61c   :  { %449 = vadd.xlane.f32.xlu0 %v448_v17 }
 0x63a   :  { %v530_v26 = vpop.permute.xlu1 %529 }
 0x63b   :  { %v536_v29 = vsel %vm233_vm3, %v909_v25, %v530_v26 }
 0x69b   :  { %v524_v20 = vpop.f32.mrb[4].mxu1 }
 0x69c   :  { %v525_v21 = vadd.f32 %v524_v20, %v454_v19  ;;  %v623_v22 = vpop.f32.mrb[5].mxu1 }
 0x69e   :  { %533 = vrot.lane.b32.xlu1 %v525_v21, %s807_s4 }
 0x6a9   :  { %v450_v28 = vpop.xlane.xlu0 %449 }
 0x6aa   :  { %v537_v30 = vsel %vm98_vm0, %v536_v29, %v450_v28 }
 0x710   :  { %v534_v32 = vpop.permute.xlu1 %533 }
 0x711   :  { %v538_v44 = vsel %vm108_vm1, %v537_v30, %v534_v32 }
 0x712   :  { %v540_v33 = vcombine.low %v538_v44, %v534_v32 }
 0x714   :  { %v547_v34 = vrot.slane %v540_v33, %v546_v31 }
 0x716   :  { %552 = vst.msk [vmem:[#allocation8] sm:$0xf] %vm551_vm9, %v547_v34 }
 0x717   :  { %782 = shalt.err (!%p779_p0)
}
 0x718   :  { %s783_s13 = scalar_lea.hbm %s959_s5, 64 }
 0x719   :  { %p784_p1 = scmp.ne.s32.totalorder %s959_s5, %s783_s13  ;;  %p787_p2 = scmp.lt.u32.totalorder %s783_s13, %s959_s5 }
 0x71b   :  { %p789_p3 = pnand %p787_p2, %p784_p1 }
 0x71d   :  { %792 = shalt.err (!%p789_p3)
}
 0x71e   :  { %562 = dma.vmem_to_hbm [thread:$0]  %s560_s9, 64, %s959_s5, [#allocation4]  }
 0x71f   :  { %797 = dma.done.wait [#allocation4], 64  }
 0x720   :  { %798 = vsyncadd [#allocation4], 4294967232 }
 0x721   :  { %566 = vsyncpa [#allocation3], 1 }
 0x722   :  { %567 = vsyncpa [#allocation6], 1 }
 0x723   :  { %568 = vsyncpa [#allocation4], 1 }

</bundles_post_ra>
